<compile_context>
chip_gen: v5e
topology: v5e:2x2
jax: 0.10.0
libtpu: 0.0.40
codegen_flags: <defaults>
</compile_context>

<pallas_src>
import functools

import jax
import jax.numpy as jnp
from jax import lax
from jax.experimental import pallas as pl
from jax.experimental.pallas import tpu as pltpu


# --------------------------------------------------------------------------
# Pass 1: online-softmax global pooling -> per-batch m vector (C, 1)
# --------------------------------------------------------------------------
def _reduce_kernel(x_ref,        # (1, C, tile)   native dtype
                   wkv_ref,      # (rv+1, C)      native dtype; rows [0,rv)=padded Wv^T, row rv=Wk^T
                   bv_ref,       # (rv, 1)  f32
                   wmT_ref,      # (C, rv)  f32
                   bmT_ref,      # (C, 1)   f32
                   m_out_ref,    # (1, C, 1) f32
                   max_sc,       # VMEM (1, 1)  f32  running max of k logits
                   sum_sc,       # VMEM (1, 1)  f32  running sum of exp
                   acc_sc,       # VMEM (rv, 1) f32  running sum of exp * v
                   *, hw, tile):
    t = pl.program_id(1)
    rv = acc_sc.shape[0]

    @pl.when(t == 0)
    def _():
        max_sc[...] = jnp.full_like(max_sc, -jnp.inf)
        sum_sc[...] = jnp.zeros_like(sum_sc)
        acc_sc[...] = jnp.zeros_like(acc_sc)

    # One MXU pass over the native-dtype x tile for both k and v projections.
    fused = jnp.dot(wkv_ref[...], x_ref[0],
                    preferred_element_type=jnp.float32)       # (rv+1, tile) f32
    v = fused[:rv, :]                                         # sublane-aligned slice
    k_logit = fused[rv:rv + 1, :]                             # (1, tile)
    # (bk intentionally dropped: softmax over HW is shift-invariant.)

    if hw % tile != 0:
        # Last grid block is clipped: drop padded lanes from the softmax pool.
        lane = lax.broadcasted_iota(jnp.int32, (1, tile), 1)
        valid = (t * tile + lane) < hw
        k_logit = jnp.where(valid, k_logit, -jnp.inf)
        v = jnp.where(valid, v, 0.0)

    tile_max = jnp.max(k_logit, axis=1, keepdims=True)        # (1, 1)
    new_max = jnp.maximum(max_sc[...], tile_max)
    corr = jnp.exp(max_sc[...] - new_max)                     # (1, 1)
    p = jnp.exp(k_logit - new_max)                            # (1, tile)

    sum_sc[...] = corr * sum_sc[...] + jnp.sum(p, axis=1, keepdims=True)
    # MXU contraction: (rv, tile) . (1, tile) over the tile axis -> (rv, 1)
    acc_sc[...] = corr * acc_sc[...] + lax.dot_general(
        v, p, (((1,), (1,)), ((), ())), preferred_element_type=jnp.float32)
    max_sc[...] = new_max

    @pl.when(t == pl.num_programs(1) - 1)
    def _():
        # softmax weights sum to 1 -> the v bias folds into y directly.
        # Exact divide: this is a once-per-batch (1,1) scalar.
        y = acc_sc[...] / sum_sc[...] + bv_ref[...]            # (rv, 1)
        m_col = jnp.dot(wmT_ref[...], y,
                        preferred_element_type=jnp.float32) + bmT_ref[...]
        m_out_ref[0] = m_col                                   # (C, 1)


# --------------------------------------------------------------------------
# Pass 2: out = x + m * sigmoid(Wa x + ba)    (fully parallel over (N, tiles))
# --------------------------------------------------------------------------
def _apply_kernel(x_ref,     # (1, C, tile)  native dtype
                  m_ref,     # (1, C, 1)     f32
                  waT_ref,   # (1, C)        native dtype
                  ba_ref,    # (1, 1)        f32 SMEM scalar
                  o_ref):    # (1, C, tile)
    x = x_ref[0]                                               # (C, tile), native dtype
    a_logit = jnp.dot(waT_ref[...], x,
                      preferred_element_type=jnp.float32) + ba_ref[0, 0]
    a = jax.nn.sigmoid(a_logit)                                # (1, tile) f32
    # Gate/modulation computed in f32 on small slabs, cast once, added natively.
    mod = (m_ref[0] * a).astype(x.dtype)                       # (C, tile)
    o_ref[0] = (x + mod).astype(o_ref.dtype)


# --------------------------------------------------------------------------
# Tile / VMEM sizing helpers (generation-aware)
# --------------------------------------------------------------------------
def _vmem_limit_bytes():
    """~3/4 of physical per-core VMEM, capped at 96 MiB:
    v5e/v6e (128 MiB) -> 96 MiB scoped limit; v7x (64 MiB) -> 48 MiB."""
    cap = 128 * 1024 * 1024
    try:
        cap = int(pltpu.get_tpu_info().vmem_capacity_bytes)
    except Exception:
        pass
    return int(min(cap * 3 // 4, 96 * 1024 * 1024))


def _pick_tile(hw, n_rows, itemsize, vmem_limit, weight_bytes):
    """Largest lane-aligned (x128) HW tile whose (n_rows, tile) block fits the
    per-block budget.  Pass 2 double-buffers both the x input block and the
    output block -> budget ~= (vmem_limit - weights) / 4.  Prefer divisors of
    HW (no masked last tile); otherwise the last grid block is clipped."""
    if hw <= 128:
        return hw
    budget = max((vmem_limit - weight_bytes) // 4, 1 << 20)
    candidates = (8192, 4096, 2048, 1024, 512, 256, 128)
    fits = [t for t in candidates if t * n_rows * itemsize <= budget] or [128]
    for t in fits:
        if hw % t == 0:
            return t
    for t in fits:
        if t <= hw:
            return t
    return 128


# --------------------------------------------------------------------------
# Wrapper
# --------------------------------------------------------------------------
def context_aggregation(x_nchw, params, tile_hw=None, donate_x=False):
    """x_nchw: (N, C, H, W). params: dict of (in, out) weight mats + biases.
    donate_x=True aliases the pass-2 output onto x's buffer (only safe if the
    caller does not use x afterwards)."""
    N, C, H, W = x_nchw.shape
    HW = H * W
    c = params["wv"].shape[1]
    rv = -(-c // 8) * 8                       # sublane-aligned v row count
    pad = rv - c

    # NCHW -> (N, C, HW): pure reshape, no transpose / extra HBM traffic.
    x = x_nchw.reshape(N, C, HW)
    dt = x.dtype
    itemsize = jnp.dtype(dt).itemsize

    # Tiny one-time weight plumbing: fuse Wk/Wv (sublane-aligned), orient for
    # the (C, HW) layout, keep the per-tile MXU operands in x's native dtype.
    wkv = jnp.concatenate(
        [jnp.pad(params["wv"].T, ((0, pad), (0, 0))), params["wk"].T],
        axis=0).astype(dt)                                               # (rv+1, C)
    bv_col = jnp.pad(params["bv"].T, ((0, pad), (0, 0))).astype(jnp.float32)  # (rv, 1)
    wmT = jnp.pad(params["wm"].T, ((0, 0), (0, pad))).astype(jnp.float32)     # (C, rv)
    bmT = params["bm"].T.astype(jnp.float32)                             # (C, 1)
    waT = params["wa"].T.astype(dt)                                      # (1, C)
    ba = params["ba"].reshape(1, 1).astype(jnp.float32)                  # (1, 1)
    # NOTE: params["bk"] is unused on purpose (softmax shift-invariance).

    weight_bytes = int(wkv.size * itemsize + waT.size * itemsize +
                       (bv_col.size + wmT.size + bmT.size + ba.size) * 4)
    vmem_limit = _vmem_limit_bytes()
    if tile_hw is None:
        tile_hw = _pick_tile(HW, C, itemsize, vmem_limit, weight_bytes)
    assert tile_hw == HW or tile_hw % 128 == 0, "HW tile must be lane-aligned"
    T = pl.cdiv(HW, tile_hw)

    rep = lambda shape: pl.BlockSpec(shape, lambda n, t: (0,) * len(shape))
    bytes_x = int(N * HW * C * itemsize)

    # ---- Pass 1: reduction over HW tiles -> m_vec (N, C, 1) ----------------
    # TODO(synk): on v7x with N==1 split the T axis over both TensorCores
    # (per-core partial max/sum/acc + tiny combine) so pass 1 uses both cores.
    reduce_kernel = functools.partial(_reduce_kernel, hw=HW, tile=tile_hw)
    m_vec = pl.pallas_call(
        reduce_kernel,
        out_shape=jax.ShapeDtypeStruct((N, C, 1), jnp.float32),
        grid_spec=pltpu.PrefetchScalarGridSpec(
            num_scalar_prefetch=0,
            grid=(N, T),
            in_specs=[
                pl.BlockSpec((1, C, tile_hw), lambda n, t: (n, 0, t)),   # x
                rep((rv + 1, C)),                                        # wkv
                rep((rv, 1)),                                            # bv
                rep((C, rv)),                                            # wmT
                rep((C, 1)),                                             # bmT
            ],
            out_specs=pl.BlockSpec((1, C, 1), lambda n, t: (n, 0, 0)),
            scratch_shapes=[pltpu.VMEM((1, 1), jnp.float32),
                            pltpu.VMEM((1, 1), jnp.float32),
                            pltpu.VMEM((rv, 1), jnp.float32)]),
        compiler_params=pltpu.CompilerParams(
            dimension_semantics=("parallel", "arbitrary"),
            vmem_limit_bytes=vmem_limit),
        cost_estimate=pl.CostEstimate(
            flops=int(2 * N * HW * C * (rv + 1) + 2 * N * HW * rv),
            transcendentals=int(N * HW),
            bytes_accessed=int(bytes_x + weight_bytes + N * C * 4)),
    )(x, wkv, bv_col, wmT, bmT)

    # ---- Pass 2: elementwise residual write --------------------------------
    out = pl.pallas_call(
        _apply_kernel,
        out_shape=jax.ShapeDtypeStruct((N, C, HW), dt),
        grid_spec=pltpu.PrefetchScalarGridSpec(
            num_scalar_prefetch=0,
            grid=(N, T),
            in_specs=[
                pl.BlockSpec((1, C, tile_hw), lambda n, t: (n, 0, t)),   # x
                pl.BlockSpec((1, C, 1), lambda n, t: (n, 0, 0)),         # m_vec
                rep((1, C)),                                             # waT
                pl.BlockSpec((1, 1), lambda n, t: (0, 0),
                             memory_space=pltpu.MemorySpace.SMEM),       # ba
            ],
            out_specs=pl.BlockSpec((1, C, tile_hw), lambda n, t: (n, 0, t))),
        compiler_params=pltpu.CompilerParams(
            dimension_semantics=("parallel", "parallel"),
            vmem_limit_bytes=vmem_limit),
        cost_estimate=pl.CostEstimate(
            flops=int(4 * N * HW * C),
            transcendentals=int(N * HW),
            bytes_accessed=int(2 * bytes_x)),
        input_output_aliases=({0: 0} if donate_x else {}),
    )(x, m_vec, waT, ba)

    # (N, C, HW) -> NCHW: pure reshape again.
    return out.reshape(N, C, H, W)


# --------------------------------------------------------------------------
# Pure-JAX reference (mirrors the PyTorch forward) and test harness
# --------------------------------------------------------------------------
def _reference(x_nchw, params):
    N, C, H, W = x_nchw.shape
    HW = H * W
    x = jnp.transpose(x_nchw, (0, 2, 3, 1)).reshape(N, HW, C).astype(jnp.float32)
    a = jax.nn.sigmoid(x @ params["wa"] + params["ba"][0, 0])            # (N,HW,1)
    k = jax.nn.softmax(x @ params["wk"] + params["bk"][0, 0], axis=1)    # (N,HW,1)
    v = x @ params["wv"] + params["bv"]                                  # (N,HW,c)
    y = jnp.sum(v * k, axis=1, keepdims=True)                            # (N,1,c)
    m = y @ params["wm"] + params["bm"]                                  # (N,1,C)
    out = x + m * a
    return jnp.transpose(out.reshape(N, H, W, C), (0, 3, 1, 2))


def make_params(key, in_channels, reduction=1, dtype=jnp.float32):
    c = max(in_channels // reduction, 1)
    ks = jax.random.split(key, 8)
    scale = 0.1
    # NOTE: the PyTorch init zeros conv `m` (forward == identity at init);
    # here all params are deterministic-random so the kernel path is exercised.
    return {
        "wa": scale * jax.random.normal(ks[0], (in_channels, 1), dtype),
        "ba": scale * jax.random.normal(ks[1], (1, 1), dtype),
        "wk": scale * jax.random.normal(ks[2], (in_channels, 1), dtype),
        "bk": scale * jax.random.normal(ks[3], (1, 1), dtype),
        "wv": scale * jax.random.normal(ks[4], (in_channels, c), dtype),
        "bv": scale * jax.random.normal(ks[5], (1, c), dtype),
        "wm": scale * jax.random.normal(ks[6], (c, in_channels), dtype),
        "bm": scale * jax.random.normal(ks[7], (1, in_channels), dtype),
    }


if __name__ == "__main__":
    key = jax.random.PRNGKey(0)
    kx, kp = jax.random.split(key)

    N, C, H, W = 2, 4, 16, 16
    x = jax.random.normal(kx, (N, C, H, W), jnp.float32)
    params = make_params(kp, in_channels=C, reduction=1)

    ref = jax.block_until_ready(_reference(x, params))

    # tile_hw=128 -> 2 HW tiles per batch: exercises the online-softmax
    # accumulation across tiles even at this toy size.
    out_tiled = jax.block_until_ready(context_aggregation(x, params, tile_hw=128))
    # Default tile: exercises the generation-aware _pick_tile / get_tpu_info path.
    out_auto = jax.block_until_ready(context_aggregation(x, params))

    assert out_tiled.shape == (N, C, H, W)
    for out in (out_tiled, out_auto):
        err = float(jnp.max(jnp.abs(out - ref)))
        assert jnp.allclose(out, ref, atol=1e-3, rtol=1e-3), err

    print("KERNEL_OK")
</pallas_src>

<mosaic_0001>
module attributes {stable_mosaic.version = 11 : i64} {
  func.func @_reduce_kernel(%arg0: i32, %arg1: i32, %arg2: memref<1x4x128xf32, #tpu.memory_space<vmem>>, %arg3: memref<9x4xf32, #tpu.memory_space<vmem>>, %arg4: memref<8x1xf32, #tpu.memory_space<vmem>>, %arg5: memref<4x8xf32, #tpu.memory_space<vmem>>, %arg6: memref<4x1xf32, #tpu.memory_space<vmem>>, %arg7: memref<1x4x1xf32, #tpu.memory_space<vmem>>, %arg8: memref<1x1xf32, #tpu.memory_space<vmem>>, %arg9: memref<1x1xf32, #tpu.memory_space<vmem>>, %arg10: memref<8x1xf32, #tpu.memory_space<vmem>>) attributes {dimension_semantics = [#tpu.dimension_semantics<parallel>, #tpu.dimension_semantics<arbitrary>], iteration_bounds = array<i64: 2, 2>, scalar_prefetch = 0 : i64, scratch_operands = 3 : i64, tpu.core_type = #tpu.core_type<tc>, window_params = [{transform_indices = @transform_0, window_bounds = array<i64: 1, 4, 128>}, {pipeline_mode = #tpu.pipeline_mode<synchronous>, transform_indices = @transform_1, window_bounds = array<i64: 9, 4>}, {pipeline_mode = #tpu.pipeline_mode<synchronous>, transform_indices = @transform_2, window_bounds = array<i64: 8, 1>}, {pipeline_mode = #tpu.pipeline_mode<synchronous>, transform_indices = @transform_3, window_bounds = array<i64: 4, 8>}, {pipeline_mode = #tpu.pipeline_mode<synchronous>, transform_indices = @transform_4, window_bounds = array<i64: 4, 1>}, {transform_indices = @transform_5, window_bounds = array<i64: 1, 4, 1>}]} {
    %c0_i32 = arith.constant 0 : i32
    %0 = arith.cmpi eq, %arg1, %c0_i32 : i32
    %1 = arith.extui %0 : i1 to i32
    %c0_i32_0 = arith.constant 0 : i32
    %2 = arith.cmpi ne, %1, %c0_i32_0 : i32
    scf.if %2 {
      %cst_23 = arith.constant 0xFF800000 : f32
      %35 = vector.broadcast %cst_23 : f32 to vector<1x1xf32>
      %c0_24 = arith.constant 0 : index
      %c0_25 = arith.constant 0 : index
      %36 = vector.load %arg8[%c0_24, %c0_25] : memref<1x1xf32, #tpu.memory_space<vmem>>, vector<1x1xf32>
      tpu.vector_store %arg8[%c0_24, %c0_25], %35 {strides = array<i32>} : memref<1x1xf32, #tpu.memory_space<vmem>>, vector<1x1xf32>,
      %cst_26 = arith.constant 0.000000e+00 : f32
      %37 = vector.broadcast %cst_26 : f32 to vector<1x1xf32>
      %c0_27 = arith.constant 0 : index
      %c0_28 = arith.constant 0 : index
      %38 = vector.load %arg9[%c0_27, %c0_28] : memref<1x1xf32, #tpu.memory_space<vmem>>, vector<1x1xf32>
      tpu.vector_store %arg9[%c0_27, %c0_28], %37 {strides = array<i32>} : memref<1x1xf32, #tpu.memory_space<vmem>>, vector<1x1xf32>,
      %cst_29 = arith.constant 0.000000e+00 : f32
      %39 = vector.broadcast %cst_29 : f32 to vector<8x1xf32>
      %c0_30 = arith.constant 0 : index
      %c0_31 = arith.constant 0 : index
      %40 = vector.load %arg10[%c0_30, %c0_31] : memref<8x1xf32, #tpu.memory_space<vmem>>, vector<8x1xf32>
      tpu.vector_store %arg10[%c0_30, %c0_31], %39 {strides = array<i32>} : memref<8x1xf32, #tpu.memory_space<vmem>>, vector<8x1xf32>,
    } else {
    }
    %c0 = arith.constant 0 : index
    %c0_1 = arith.constant 0 : index
    %3 = vector.load %arg3[%c0, %c0_1] : memref<9x4xf32, #tpu.memory_space<vmem>>, vector<9x4xf32>
    %c0_2 = arith.constant 0 : index
    %c0_3 = arith.constant 0 : index
    %c0_4 = arith.constant 0 : index
    %4 = vector.load %arg2[%c0_2, %c0_3, %c0_4] : memref<1x4x128xf32, #tpu.memory_space<vmem>>, vector<1x4x128xf32>
    %5 = vector.shape_cast %4 : vector<1x4x128xf32> to vector<4x128xf32>
    %cst = arith.constant dense<0.000000e+00> : vector<9x128xf32>
    %6 = tpu.matmul %3, %5, %cst {dimension_numbers = #tpu.dot_dimension_numbers<[1], [0], [0], [1], [0, 0, 1, 1], [], []>} : vector<9x4xf32>, vector<4x128xf32>, vector<9x128xf32> -> vector<9x128xf32>
    %7 = vector.extract_strided_slice %6 {offsets = [0, 0], sizes = [8, 128], strides = [1, 1]} : vector<9x128xf32> to vector<8x128xf32>
    %8 = vector.extract_strided_slice %6 {offsets = [8, 0], sizes = [1, 128], strides = [1, 1]} : vector<9x128xf32> to vector<1x128xf32>
    %cst_5 = arith.constant dense<0xFF800000> : vector<1xf32>
    %9 = vector.multi_reduction <maximumf>, %8, %cst_5 [1] : vector<1x128xf32> to vector<1xf32>
    %10 = vector.shape_cast %9 : vector<1xf32> to vector<1x1xf32>
    %c0_6 = arith.constant 0 : index
    %c0_7 = arith.constant 0 : index
    %11 = vector.load %arg8[%c0_6, %c0_7] : memref<1x1xf32, #tpu.memory_space<vmem>>, vector<1x1xf32>
    %12 = arith.maximumf %11, %10 : vector<1x1xf32>
    %c0_8 = arith.constant 0 : index
    %c0_9 = arith.constant 0 : index
    %13 = vector.load %arg8[%c0_8, %c0_9] : memref<1x1xf32, #tpu.memory_space<vmem>>, vector<1x1xf32>
    %14 = arith.subf %13, %12 : vector<1x1xf32>
    %15 = math.exp %14 : vector<1x1xf32>
    %16 = vector.broadcast %12 : vector<1x1xf32> to vector<1x128xf32>
    %17 = arith.subf %8, %16 : vector<1x128xf32>
    %18 = math.exp %17 : vector<1x128xf32>
    %c0_10 = arith.constant 0 : index
    %c0_11 = arith.constant 0 : index
    %19 = vector.load %arg9[%c0_10, %c0_11] : memref<1x1xf32, #tpu.memory_space<vmem>>, vector<1x1xf32>
    %20 = arith.mulf %15, %19 : vector<1x1xf32>
    %cst_12 = arith.constant dense<0.000000e+00> : vector<1xf32>
    %21 = vector.multi_reduction <add>, %18, %cst_12 [1] : vector<1x128xf32> to vector<1xf32>
    %22 = vector.shape_cast %21 : vector<1xf32> to vector<1x1xf32>
    %23 = arith.addf %20, %22 : vector<1x1xf32>
    %c0_13 = arith.constant 0 : index
    %c0_14 = arith.constant 0 : index
    %24 = vector.load %arg9[%c0_13, %c0_14] : memref<1x1xf32, #tpu.memory_space<vmem>>, vector<1x1xf32>
    tpu.vector_store %arg9[%c0_13, %c0_14], %23 {strides = array<i32>} : memref<1x1xf32, #tpu.memory_space<vmem>>, vector<1x1xf32>,
    %c0_15 = arith.constant 0 : index
    %c0_16 = arith.constant 0 : index
    %25 = vector.load %arg10[%c0_15, %c0_16] : memref<8x1xf32, #tpu.memory_space<vmem>>, vector<8x1xf32>
    %26 = vector.broadcast %15 : vector<1x1xf32> to vector<8x1xf32>
    %27 = arith.mulf %26, %25 : vector<8x1xf32>
    %cst_17 = arith.constant dense<0.000000e+00> : vector<8x1xf32>
    %28 = tpu.matmul %7, %18, %cst_17 {dimension_numbers = #tpu.dot_dimension_numbers<[1], [1], [0], [0], [0, 0, 1, 0], [], []>} : vector<8x128xf32>, vector<1x128xf32>, vector<8x1xf32> -> vector<8x1xf32>
    %29 = arith.addf %27, %28 : vector<8x1xf32>
    %c0_18 = arith.constant 0 : index
    %c0_19 = arith.constant 0 : index
    %30 = vector.load %arg10[%c0_18, %c0_19] : memref<8x1xf32, #tpu.memory_space<vmem>>, vector<8x1xf32>
    tpu.vector_store %arg10[%c0_18, %c0_19], %29 {strides = array<i32>} : memref<8x1xf32, #tpu.memory_space<vmem>>, vector<8x1xf32>,
    %c0_20 = arith.constant 0 : index
    %c0_21 = arith.constant 0 : index
    %31 = vector.load %arg8[%c0_20, %c0_21] : memref<1x1xf32, #tpu.memory_space<vmem>>, vector<1x1xf32>
    tpu.vector_store %arg8[%c0_20, %c0_21], %12 {strides = array<i32>} : memref<1x1xf32, #tpu.memory_space<vmem>>, vector<1x1xf32>,
    %c1_i32 = arith.constant 1 : i32
    %32 = arith.cmpi eq, %arg1, %c1_i32 : i32
    %33 = arith.extui %32 : i1 to i32
    %c0_i32_22 = arith.constant 0 : i32
    %34 = arith.cmpi ne, %33, %c0_i32_22 : i32
    scf.if %34 {
      %c0_23 = arith.constant 0 : index
      %c0_24 = arith.constant 0 : index
      %35 = vector.load %arg10[%c0_23, %c0_24] : memref<8x1xf32, #tpu.memory_space<vmem>>, vector<8x1xf32>
      %c0_25 = arith.constant 0 : index
      %c0_26 = arith.constant 0 : index
      %36 = vector.load %arg9[%c0_25, %c0_26] : memref<1x1xf32, #tpu.memory_space<vmem>>, vector<1x1xf32>
      %37 = vector.broadcast %36 : vector<1x1xf32> to vector<8x1xf32>
      %38 = arith.divf %35, %37 : vector<8x1xf32>
      %c0_27 = arith.constant 0 : index
      %c0_28 = arith.constant 0 : index
      %39 = vector.load %arg4[%c0_27, %c0_28] : memref<8x1xf32, #tpu.memory_space<vmem>>, vector<8x1xf32>
      %40 = arith.addf %38, %39 : vector<8x1xf32>
      %c0_29 = arith.constant 0 : index
      %c0_30 = arith.constant 0 : index
      %41 = vector.load %arg5[%c0_29, %c0_30] : memref<4x8xf32, #tpu.memory_space<vmem>>, vector<4x8xf32>
      %cst_31 = arith.constant dense<0.000000e+00> : vector<4x1xf32>
      %42 = tpu.matmul %41, %40, %cst_31 {dimension_numbers = #tpu.dot_dimension_numbers<[1], [0], [0], [1], [0, 0, 1, 1], [], []>} : vector<4x8xf32>, vector<8x1xf32>, vector<4x1xf32> -> vector<4x1xf32>
      %c0_32 = arith.constant 0 : index
      %c0_33 = arith.constant 0 : index
      %43 = vector.load %arg6[%c0_32, %c0_33] : memref<4x1xf32, #tpu.memory_space<vmem>>, vector<4x1xf32>
      %44 = arith.addf %42, %43 : vector<4x1xf32>
      %c0_34 = arith.constant 0 : index
      %c0_35 = arith.constant 0 : index
      %c0_36 = arith.constant 0 : index
      %45 = vector.load %arg7[%c0_34, %c0_35, %c0_36] : memref<1x4x1xf32, #tpu.memory_space<vmem>>, vector<1x4x1xf32>
      %46 = vector.shape_cast %45 : vector<1x4x1xf32> to vector<4x1xf32>
      %47 = vector.shape_cast %44 : vector<4x1xf32> to vector<1x4x1xf32>
      tpu.vector_store %arg7[%c0_34, %c0_35, %c0_36], %47 {strides = array<i32>} : memref<1x4x1xf32, #tpu.memory_space<vmem>>, vector<1x4x1xf32>,
    } else {
    }
    return
  }
  func.func @transform_0(%arg0: i32, %arg1: i32) -> (i32, i32, i32) {
    %c0_i32 = arith.constant 0 : i32
    %c0_i32_0 = arith.constant 0 : i32
    return %arg0, %c0_i32, %arg1 : i32, i32, i32
  }
  func.func @transform_1(%arg0: i32, %arg1: i32) -> (i32, i32) {
    %c0_i32 = arith.constant 0 : i32
    %c0_i32_0 = arith.constant 0 : i32
    %c0_i32_1 = arith.constant 0 : i32
    return %c0_i32, %c0_i32_0 : i32, i32
  }
  func.func @transform_2(%arg0: i32, %arg1: i32) -> (i32, i32) {
    %c0_i32 = arith.constant 0 : i32
    %c0_i32_0 = arith.constant 0 : i32
    %c0_i32_1 = arith.constant 0 : i32
    return %c0_i32, %c0_i32_0 : i32, i32
  }
  func.func @transform_3(%arg0: i32, %arg1: i32) -> (i32, i32) {
    %c0_i32 = arith.constant 0 : i32
    %c0_i32_0 = arith.constant 0 : i32
    %c0_i32_1 = arith.constant 0 : i32
    return %c0_i32, %c0_i32_0 : i32, i32
  }
  func.func @transform_4(%arg0: i32, %arg1: i32) -> (i32, i32) {
    %c0_i32 = arith.constant 0 : i32
    %c0_i32_0 = arith.constant 0 : i32
    %c0_i32_1 = arith.constant 0 : i32
    return %c0_i32, %c0_i32_0 : i32, i32
  }
  func.func @transform_5(%arg0: i32, %arg1: i32) -> (i32, i32, i32) {
    %c0_i32 = arith.constant 0 : i32
    %c0_i32_0 = arith.constant 0 : i32
    %c0_i32_1 = arith.constant 0 : i32
    return %arg0, %c0_i32, %c0_i32_0 : i32, i32, i32
  }
}

</mosaic_0001>

<bundles_post_ra>
// kernel: tpu_custom_call.1
= control target key start
LH: loop header
LB: loop body
LE: loop exit
PB: predicated region body
PF: predicated region fallthrough
CT: control target
= control target key end

     0   :  { %s596_s18 = smov 0   ;;  %s598_s19 = smov 0   ;;  %s675_s0 = inlined_call_operand.vmem [shape: f32[2,4,256], index: 0, kind: input, shape index: {}]   ;;  %s676_s1 = inlined_call_operand.vmem [shape: f32[9,4], index: 1, kind: input, shape index: {}]   ;;  %s677_s2 = inlined_call_operand.vmem [shape: f32[8,1], index: 2, kind: input, shape index: {}]   ;;  %s678_s3 = inlined_call_operand.vmem [shape: f32[4,8], index: 3, kind: input, shape index: {}]   ;;  %s679_s4 = inlined_call_operand.vmem [shape: f32[4,1], index: 4, kind: input, shape index: {}]   ;;  %s680_s5 = inlined_call_operand.vmem [shape: f32[2,4,1], index: 5, kind: output, shape index: {}]  }
   0x1   :  { %s600_s20 = smov 0   ;;  %s602_s21 = smov 0  }
   0x2   :  { %s604_s22 = smov 0  }
   0x3 LB: > { %s24_s23 = sadd.s32 1, %s553_s20  ;;  %s27_s24 = sadd.s32 1, %s557_s21  ;;  %s561_s22 = sphi %s604_s22, %s15_s22   ;;  %s557_s21 = sphi %s602_s21, %s684_s21   ;;  %s553_s20 = sphi %s600_s20, %s683_s20   ;;  %s549_s19 = sphi %s598_s19, %s682_s19   ;;  %s545_s18 = sphi %s596_s18, %s681_s18  }
   0x4   : > { %p25_p0 = scmp.ge.s32.totalorder %s24_s23, 2  ;;  %p459_p1 = scmp.ge.s32.totalorder %s561_s22, 1 }
   0x5   : > { %p204_p2 = scmp.lt.s32.totalorder %s561_s22, 5 }
   0x6   : > { %s686_s23 = smov (%p25_p0, %s24_s23), 0  ;;  %s688_s24 = smov (!%p25_p0, %s27_s24), %s557_s21 }
   0x7   : > { %p205_p3 = pnand %p459_p1, %p204_p2  ;;  %p29_p4 = scmp.ge.s32.totalorder %s688_s24, 2 }
   0x8   : > { %p234_p5 = scmp.lt.s32.totalorder (!%p205_p3), %s549_s19, 1  ;;  %p236_p6 = scmp.lt.s32.totalorder (!%p205_p3), %s545_s18, 1 }
   0x9   : > { %s690_s24 = smov (%p29_p4, %s688_s24), 0  ;;  %208 = sbr.rel (%p205_p3) target bundleno = 682 (0x2aa), region = 40 }
   0xa   : > { %p463_p7 = scmp.ne.s32.totalorder (!%p205_p3), %s545_s18, 0 }
   0xe   : > { %s692_s19 = smov (!%p234_p5, %s549_s19), 1 }
   0xf   : > { %s237_s25 = scalar_select %p236_p6, %s545_s18, 1 }
  0x10   : > { %s460_s26 = sshll.u32 %s692_s19, 1  ;;  %s462_s27 = sshll.u32 %s692_s19, 2 }
  0x11   : > { %s239_s28 = sadd.s32 %s460_s26, %s237_s25  ;;  %s633_s6 = scalar_lea.vmem %s680_s5, %s462_s27 }
  0x12   : > { %s461_s7 = sshll.u32 %s239_s28, 2  ;;  %249 = sbr.rel (%p463_p7) target bundleno = 27 (0x1b), region = 44 }
  0x13   : > { %s241_s10 = scalar_lea.vmem %s675_s0, %s461_s7 }
  0x17   : > { %vm250_vm0 = vcmask 0   ;;  %vm253_vm1 = vcmask 7168   ;;  %v563_v0 = vmov -inf   ;;  %v564_v1 = vmov 0.0  }
  0x18   : > { %251 = vst.msk [vmem:[#allocation2] sm:$0x1] %vm250_vm0, %v563_v0 }
  0x19   : > { %252 = vst.msk [vmem:[#allocation3] sm:$0x1] %vm250_vm0, %v564_v1 }
  0x1a   : > { %254 = vst.msk [vmem:[#allocation4] sm:$0xff] %vm253_vm1, %v564_v1 }
  0x1b PF: > { %v257_v2 = vld [vmem:[%s241_s10] sm:$0xf]  ;;  %vm265_vm2 = vcmask 1043456   ;;  %v256_v3 = vld [vmem:[%s676_s1 + $0x8] sm:$0x1]  ;;  %vm258_vm3 = vcmask 31744  }
  0x1c   : > { %471 = vmatpush.msk.msra.mxu1 %vm265_vm2, %v257_v2  ;;  %464 = vmatpush.msk.msra.mxu0 %vm265_vm2, %v257_v2  ;;  %vm292_vm4 = vcmask 1040384   ;;  %v565_v6 = vmov 0   ;;  %v255_v7 = vld [vmem:[%s676_s1] sm:$0xff]  ;;  %vm316_vm5 = vcmask 0   ;;  %vm328_vm6 = vcmask 7168   ;;  %p467_p8 = scmp.ne.s32.totalorder %s545_s18, 1 }
  0x1d   : > { %466 = vmatmul.msk.f32.vlgmr.msra.gmra.mxu1 %vm258_vm3, %v256_v3  ;;  %515 = vset.pattern.permute.xlu0 %v565_v6 }
  0x1e   : > { %465 = vmatmul.msk.f32.vlgmr.msra.gmra.mxu0 %vm258_vm3, %v255_v7 }
  0x1f   : > { %v296_v8 = vld [vmem:[#allocation2] sm:$0x1] }
  0x20   : > { %v310_v23 = vld [vmem:[#allocation3] sm:$0x1] }
  0x21   : > { %v318_v28 = vld [vmem:[#allocation4] sm:$0xff] }
  0x9a   : > { %v289_v4 = vpop.f32.mrf.mxu1 }
  0x9b   : > { %v293_v5 = vsel %vm292_vm4, %v289_v4, -inf  ;;  %v286_v19 = vpop.f32.mrf.mxu0 }
  0x9c   : > { %294 = vmax.xlane.f32.xlu0 %v293_v5 }
 0x10f   : > { %v295_v9 = vpop.xlane.xlu0 %294 }
 0x110   : > { %v297_v10 = vmax.f32 %v296_v8, %v295_v9 }
 0x112   : > { %v298_v11 = vsub.f32 %v296_v8, %v297_v10  ;;  %330 = vst.msk [vmem:[#allocation2] sm:$0x1] %vm316_vm5, %v297_v10  ;;  %303 = vperm.xlu0 %515, %v297_v10  }
 0x114   : > { %v299_v21 = vmul.f32 1.442695, %v298_v11 }
 0x184   : > { %v304_v12 = vpop.permute.xlu0 %303 }
 0x185   : > { %v306_v13 = vperm.slane %v304_v12, 0 }
 0x187   : > { %v307_v14 = vsub.f32 %v289_v4, %v306_v13 }
 0x189   : > { %v308_v15 = vmul.f32 1.442695, %v307_v14 }
 0x18b   : > { %516 = vpow2.f32 %v308_v15 }
 0x18c   : > { %518 = vpow2.f32 %v299_v21 }
 0x191   : > { %v517_v16 = vpop.eup %516 }
 0x192   : > { %v312_v17 = vsel %vm292_vm4, %v517_v16, 0.0  ;;  %v323_v18 = vperm.slane %v517_v16, 0  ;;  %v519_v22 = vpop.eup %518 }
 0x193   : > { %313 = vadd.xlane.f32.xlu1 %v312_v17  ;;  %v311_v24 = vmul.f32 %v519_v22, %v310_v23  ;;  %v320_v27 = vperm.slane %v519_v22, 0 }
 0x194   : > { %v324_v20 = vmul.f32 %v323_v18, %v286_v19 }
 0x195   : > { %v322_v29 = vmul.f32 %v320_v27, %v318_v28 }
 0x19b   : > { %325 = vadd.xlane.f32.xlu1 %v324_v20 }
 0x206   : > { %v314_v25 = vpop.xlane.xlu1 %313 }
 0x207   : > { %v315_v26 = vadd.f32 %v314_v25, %v311_v24 }
 0x209   : > { %317 = vst.msk [vmem:[#allocation3] sm:$0x1] %vm316_vm5, %v315_v26 }
 0x20d   : > { %334 = sbr.rel (%p467_p8) target bundleno = 682 (0x2aa), region = 48 }
 0x20e   : > { %v326_v30 = vpop.xlane.xlu1 %325 }
 0x20f   : > { %v327_v31 = vadd.f32 %v326_v30, %v322_v29 }
 0x211   : > { %329 = vst.msk [vmem:[#allocation4] sm:$0xff] %vm328_vm6, %v327_v31 }
 0x212   : > { %v520_v32 = vld [vmem:[#allocation3] ss:$0 sm:$0xff]  ;;  %vm359_vm11 = vcmask 64512   ;;  %vm383_vm12 = vcmask 3072  }
 0x213   : > { %521 = vrcp.f32 %v520_v32  ;;  %v351_v35 = vand.u32 2147483648, %v520_v32  ;;  %vm345_vm7 = vweird.f32 %v520_v32  ;;  %v349_v37 = vand.u32 2147483647, %v520_v32  ;;  %v355_v44 = vld [vmem:[%s677_s2] sm:$0xff] }
 0x214   : > { %v357_v47 = vld [vmem:[%s678_s3] sm:$0xf] }
 0x215   : > { %v352_v39 = vor.u32 1.1754944e-38, %v351_v35  ;;  %vm350_vm10 = vcmp.eq.f32.partialorder %v349_v37, 8.507059e+37  ;;  %v358_v48 = vld [vmem:[%s679_s4] sm:$0xf] }
 0x218   : > { %v335_v41 = vld [vmem:[#allocation4] sm:$0xff] }
 0x219   : > { %v522_v33 = vpop.eup %521 }
 0x21a   : > { %v341_v34 = vmul.f32 %v522_v33, %v520_v32  ;;  %vm346_vm8 = vweird.f32 %v522_v33 }
 0x21b   : > { %vm347_vm9 = vmor %vm345_vm7, %vm346_vm8 }
 0x21c   : > { %v342_v36 = vsub.f32 1.0, %v341_v34 }
 0x21e   : > { %v343_v38 = vmul.f32 %v522_v33, %v342_v36 }
 0x220   : > { %v344_v40 = vadd.f32 %v522_v33, %v343_v38 }
 0x222   : > { %v348_v42 = vsel %vm347_vm9, %v522_v33, %v344_v40 }
 0x223   : > { %v353_v43 = vsel %vm350_vm10, %v352_v39, %v348_v42 }
 0x224   : > { %v354_v45 = vmul.f32 %v353_v43, %v335_v41 }
 0x226   : > { %v356_v46 = vadd.f32 %v355_v44, %v354_v45 }
 0x228   : > { %378 = vmatpush.msra.mxu0 %v356_v46 }
 0x229   : > { %468 = vmatmul.msk.f32.vlgmr.msra.gmra.mxu0 %vm359_vm11, %v357_v47 }
 0x2a6   : > { %v380_v49 = vpop.f32.mrf.mxu0 }
 0x2a7   : > { %v381_v50 = vadd.f32 %v380_v49, %v358_v48 }
 0x2a9   : > { %384 = vst.msk [vmem:[%s633_s6] sm:$0xf] %vm383_vm12, %v381_v50 }
 0x2aa PF: > { %s15_s22 = sadd.s32 1, %s561_s22   ;;  %s681_s18 = smov %s553_s20 }
 0x2ab   : > { %p12_p9 = scmp.ge.s32.totalorder %s15_s22, 6   ;;  %s682_s19 = smov %s557_s21 }
 0x2ac   : > { %s683_s20 = smov %s686_s23  ;;  %s684_s21 = smov %s690_s24 }
 0x2ad   :  { %14 = sbr.rel (!%p12_p9) target bundleno = 3 (0x3), region = 78 }

</bundles_post_ra>
